<compile_context>
chip_gen: v6e
topology: v6e:2x2x1
jax: 0.10.0
libtpu: 0.0.40
codegen_flags: <defaults>
</compile_context>

<pallas_src>
import jax
import jax.numpy as jnp
import numpy as np
from jax.experimental import pallas as pl
from jax.experimental.pallas import tpu as pltpu

EPS = 1e-5
_BIG = 2 ** 30  # pillar-id sentinel for padded points (never matches any tile)


# ---------------------------------------------------------------------------
# Kernel 1: point-wise MLP (Linear+BN+ReLU x2), BN folded into the weights.
# Transposed layout: channels on sublanes, points on lanes (lane-dense stores).
# ---------------------------------------------------------------------------
def _mlp_kernel(xt_ref, w1_ref, b1_ref, w2_ref, b2_ref, feat_ref):
  h = jnp.dot(w1_ref[...], xt_ref[...], preferred_element_type=jnp.float32)
  h = jnp.maximum(h + b1_ref[...], 0.0)
  h = jnp.dot(w2_ref[...], h, preferred_element_type=jnp.float32)
  feat_ref[...] = jnp.maximum(h + b2_ref[...], 0.0)


def pointnet_mlp(xt, w1t, b1t, w2t, b2t, *, chunk):
  cin, npad = xt.shape
  f = w1t.shape[0]
  n_chunks = npad // chunk
  return pl.pallas_call(
      _mlp_kernel,
      out_shape=jax.ShapeDtypeStruct((f, npad), jnp.float32),
      grid_spec=pltpu.PrefetchScalarGridSpec(
          num_scalar_prefetch=0,
          grid=(n_chunks,),
          in_specs=[
              pl.BlockSpec((cin, chunk), lambda j: (0, j)),
              pl.BlockSpec((f, cin), lambda j: (0, 0)),
              pl.BlockSpec((f, 1), lambda j: (0, 0)),
              pl.BlockSpec((f, f), lambda j: (0, 0)),
              pl.BlockSpec((f, 1), lambda j: (0, 0)),
          ],
          out_specs=pl.BlockSpec((f, chunk), lambda j: (0, j)),
      ),
      compiler_params=pltpu.CompilerParams(
          dimension_semantics=("parallel",),
          vmem_limit_bytes=32 * 1024 * 1024),
  )(xt, w1t, b1t, w2t, b2t)


# ---------------------------------------------------------------------------
# Kernel 2: segmented max over SORTED pillar ids, driven by a flat work-pair
# list (pillar-tile, point-chunk).  Per pair:
#   1) segmented all-to-all max inside the chunk (bidirectional doubling),
#   2) one-hot "segment emit" matmul places each segment's max in its pillar
#      column of the (F, tp) running-max output block.
# The output block is resident across consecutive pairs of the same tile and
# zero-initialized on the tile's first pair (0 is valid only because features
# are post-ReLU >= 0).
# ---------------------------------------------------------------------------
def _scatter_max_kernel(tile_ref, chunk_ref, first_ref,
                        inv_ref, emit_ref, feat_ref, out_ref):
  w = pl.program_id(0)
  tp = out_ref.shape[1]
  c = feat_ref.shape[1]
  base = tile_ref[w] * tp

  @pl.when(first_ref[w] == 1)
  def _init():
    out_ref[...] = jnp.zeros_like(out_ref)

  seg = inv_ref[...]                     # (1, C) int32, non-decreasing
  v = feat_ref[...]                      # (F, C) f32

  # Segmented max within the chunk: after ceil(log2(C)) doubling steps every
  # lane holds the chunk-local max of its segment (roll-direction agnostic).
  k = 1
  while k < c:
    shifts = (k,) if (c - k) == k else (k, c - k)
    for sh in shifts:
      v_sh = pltpu.roll(v, shift=sh, axis=1)
      s_sh = pltpu.roll(seg, shift=sh, axis=1)
      v = jnp.where(s_sh == seg, jnp.maximum(v, v_sh), v)
    k *= 2

  # Exactly one emit lane per (segment, chunk) carries a 1 in its pillar's
  # column; the MXU matmul places the per-segment maxima into (F, tp).
  rel = seg - base                                              # (1, C)
  rows = jax.lax.broadcasted_iota(jnp.int32, (tp, 1), 0)        # (tp, 1)
  sel = (rel == rows) & (emit_ref[...] == 1)                    # (tp, C)
  onehot_t = jnp.where(sel, 1.0, 0.0).astype(jnp.float32)
  contrib = jax.lax.dot_general(
      v, onehot_t, (((1,), (1,)), ((), ())),
      preferred_element_type=jnp.float32)                       # (F, tp)
  out_ref[...] = jnp.maximum(out_ref[...], contrib)


def pillar_scatter_max(pair_tile, pair_chunk, pair_first, inv2d, emit2d, featT,
                       *, ppad, tp, chunk):
  f, _ = featT.shape
  w_bound = pair_tile.shape[0]
  return pl.pallas_call(
      _scatter_max_kernel,
      out_shape=jax.ShapeDtypeStruct((f, ppad), jnp.float32),
      grid_spec=pltpu.PrefetchScalarGridSpec(
          num_scalar_prefetch=3,
          grid=(w_bound,),
          in_specs=[
              pl.BlockSpec((1, chunk), lambda w, t, ck, fi: (0, ck[w])),
              pl.BlockSpec((1, chunk), lambda w, t, ck, fi: (0, ck[w])),
              pl.BlockSpec((f, chunk), lambda w, t, ck, fi: (0, ck[w])),
          ],
          out_specs=pl.BlockSpec((f, tp), lambda w, t, ck, fi: (0, t[w])),
      ),
      compiler_params=pltpu.CompilerParams(
          dimension_semantics=("arbitrary",),
          vmem_limit_bytes=32 * 1024 * 1024),
  )(pair_tile, pair_chunk, pair_first, inv2d, emit2d, featT)


# ---------------------------------------------------------------------------
# Full forward pass.
# ---------------------------------------------------------------------------
def point_pillar_forward(lidar, num_points, params, *, min_x, max_x, min_y,
                         max_y, ppm, tp=128, chunk=1024):
  """Returns (canvas NCHW, aux dict with hot-path intermediates)."""
  b, nmax, cdim = lidar.shape
  nx = (max_x - min_x) * ppm
  ny = (max_y - min_y) * ppm
  f = params["w2"].shape[1]
  n_tot = b * nmax
  sent = b * nx * ny                      # linear key sentinel for dropped points

  # ---- preprocessing glue (mirrors the torch.no_grad() section) ----
  pts = lidar.reshape(n_tot, cdim).astype(jnp.float32)
  batch_id = jnp.repeat(jnp.arange(b, dtype=jnp.int32), nmax)
  point_idx = jnp.tile(jnp.arange(nmax, dtype=jnp.int32), b)
  valid = point_idx < num_points[batch_id]

  x = pts[:, 0]
  y = pts[:, 1]
  keep = valid & (x >= min_x) & (x < max_x) & (y >= min_y) & (y < max_y)

  x_pix = ((x - min_x) * ppm).astype(jnp.int32)
  y_pix = ((y - min_y) * ppm).astype(jnp.int32)

  # ONE linear-key sort replaces unique(axis=0) + argsort(inverse).
  pkey = jnp.where(keep, batch_id * (nx * ny) + x_pix * ny + y_pix,
                   sent).astype(jnp.int32)
  order = jnp.argsort(pkey)
  key_s = pkey[order]
  pts_s = pts[order]
  xpix_s = x_pix[order]
  ypix_s = y_pix[order]

  new_seg = jnp.concatenate(
      [jnp.ones((1,), jnp.bool_), key_s[1:] != key_s[:-1]])
  seg_id = (jnp.cumsum(new_seg.astype(jnp.int32)) - 1).astype(jnp.int32)

  # Structural cap: seg_id < #distinct keys <= min(n_tot, B*nx*ny + 1).
  num_pillars = int(min(n_tot, b * nx * ny + 1))

  counts = jax.ops.segment_sum(jnp.ones((n_tot,), jnp.float32), seg_id,
                               num_segments=num_pillars, indices_are_sorted=True)
  seg_key = jax.ops.segment_max(key_s, seg_id, num_segments=num_pillars,
                                indices_are_sorted=True)

  # ---- decorate (literal reproduction of the reference column usage) ----
  xyz = pts_s[:, :3]
  seg_sum = jax.ops.segment_sum(xyz, seg_id, num_segments=num_pillars,
                                indices_are_sorted=True)
  means = seg_sum / jnp.maximum(counts[:, None], 1.0)
  points_cluster = xyz - means[seg_id]
  x_centers = ypix_s.astype(jnp.float32)[:, None] / ppm + min_x
  y_centers = xpix_s.astype(jnp.float32)[:, None] / ppm + min_y
  points_xp = xyz[:, :1] - x_centers
  points_yp = xyz[:, 1:2] - y_centers
  feats = jnp.concatenate([pts_s, points_cluster, points_xp, points_yp],
                          axis=-1)                               # (n_tot, 9)

  # ---- fold BatchNorm (eval mode) into the Linear weights ----
  s1 = params["g1"] * jax.lax.rsqrt(params["v1"] + EPS)
  w1f = params["w1"] * s1
  b1f = (params["b1"] - params["m1"]) * s1 + params["be1"]
  s2 = params["g2"] * jax.lax.rsqrt(params["v2"] + EPS)
  w2f = params["w2"] * s2
  b2f = (params["b2"] - params["m2"]) * s2 + params["be2"]

  cin = feats.shape[1]
  cin_pad = -(-cin // 8) * 8              # 9 -> 16 (do NOT pad to 128; HBM-bound)
  npad = -(-n_tot // chunk) * chunk
  n_chunks = npad // chunk

  xt = jnp.zeros((cin_pad, npad), jnp.float32).at[:cin, :n_tot].set(feats.T)
  w1t = jnp.zeros((f, cin_pad), jnp.float32).at[:, :cin].set(w1f.T)
  b1t = b1f.reshape(f, 1)
  w2t = w2f.T
  b2t = b2f.reshape(f, 1)

  # hot path 1: point MLP (transposed, lane-dense, large chunk).
  featT = pointnet_mlp(xt, w1t, b1t, w2t, b2t, chunk=chunk)      # (f, npad)

  # ---- scatter-max metadata: flat (pillar-tile, chunk) work-pair list ----
  ppad = -(-num_pillars // tp) * tp
  n_tiles = ppad // tp

  inv_pad = jnp.full((npad,), _BIG, jnp.int32).at[:n_tot].set(seg_id)
  nxt = jnp.concatenate([inv_pad[1:], jnp.full((1,), -1, jnp.int32)])
  pos = jnp.arange(npad, dtype=jnp.int32)
  emit = ((inv_pad != nxt) | ((pos % chunk) == (chunk - 1))).astype(jnp.int32)

  pt_tile = inv_pad // tp
  tiles = jnp.arange(n_tiles, dtype=jnp.int32)
  first_pt = jnp.searchsorted(pt_tile, tiles, side="left")
  last_pt = jnp.searchsorted(pt_tile, tiles, side="right") - 1
  covered = last_pt >= first_pt
  chunk_lo = jnp.where(covered, first_pt // chunk, 0).astype(jnp.int32)
  chunk_hi = jnp.where(covered, last_pt // chunk, 0).astype(jnp.int32)
  n_pairs = chunk_hi - chunk_lo + 1               # >= 1 (uncovered: dummy pair)
  pair_off = jnp.cumsum(n_pairs) - n_pairs
  w_real = pair_off[-1] + n_pairs[-1]

  w_bound = n_tiles + n_chunks                    # static, linear bound
  w_idx = jnp.arange(w_bound, dtype=jnp.int32)
  tile_of_w = jnp.clip(
      jnp.searchsorted(pair_off, w_idx, side="right") - 1, 0, n_tiles - 1
  ).astype(jnp.int32)
  local = w_idx - pair_off[tile_of_w]
  pair_chunk = jnp.minimum(chunk_lo[tile_of_w] + local,
                           chunk_hi[tile_of_w]).astype(jnp.int32)
  pair_first = ((local == 0) & (w_idx < w_real)).astype(jnp.int32)

  # hot path 2: segmented scatter-max over the sparse work-pair grid.
  featT_max = pillar_scatter_max(
      tile_of_w, pair_chunk, pair_first,
      inv_pad.reshape(1, npad), emit.reshape(1, npad), featT,
      ppad=ppad, tp=tp, chunk=chunk)                              # (f, ppad)
  feat_max = featT_max.T[:num_pillars]                            # (P, f)

  # ---- scatter_points: canvas built directly in NCHW ----
  valid_pillar = (seg_key >= 0) & (seg_key < sent)
  k_dec = jnp.clip(seg_key, 0, sent - 1)
  bp = k_dec // (nx * ny)
  rem = k_dec - bp * (nx * ny)
  xp_p = rem // ny
  yp_p = rem - xp_p * ny
  b_idx = jnp.where(valid_pillar, bp, b)          # invalid -> dummy batch slot
  row = jnp.clip(ny - 1 - xp_p, 0, ny - 1)
  col = jnp.clip(yp_p, 0, nx - 1)
  canvas = jnp.zeros((b + 1, f, ny, nx), jnp.float32)
  canvas = canvas.at[b_idx, :, row, col].set(feat_max)[:b]        # NCHW

  aux = {"feats": feats, "seg_id": seg_id, "counts": counts,
         "feat_max": feat_max, "seg_key": seg_key}
  return canvas, aux


def _mlp_ref(x, p):
  h = x @ p["w1"] + p["b1"]
  h = (h - p["m1"]) * jax.lax.rsqrt(p["v1"] + EPS) * p["g1"] + p["be1"]
  h = jnp.maximum(h, 0.0)
  h = h @ p["w2"] + p["b2"]
  h = (h - p["m2"]) * jax.lax.rsqrt(p["v2"] + EPS) * p["g2"] + p["be2"]
  return jnp.maximum(h, 0.0)


if __name__ == "__main__":
  # Small, module-consistent config: nx = (max_x-min_x)*ppm = 16, ny = 16.
  min_x, max_x, min_y, max_y, ppm = 0, 8, -4, 4, 2
  num_input, num_feat = 9, 32
  B, Nmax = 2, 64

  key = jax.random.PRNGKey(0)
  keys = jax.random.split(key, 13)
  # Linear weights stored as (in, out) so the reference computes x @ W.
  params = {
      "w1": 0.3 * jax.random.normal(keys[0], (num_input, num_feat), jnp.float32),
      "b1": 0.1 * jax.random.normal(keys[1], (1, num_feat), jnp.float32),
      "g1": 1.0 + 0.1 * jax.random.normal(keys[2], (1, num_feat), jnp.float32),
      "be1": 0.1 * jax.random.normal(keys[3], (1, num_feat), jnp.float32),
      "m1": 0.1 * jax.random.normal(keys[4], (1, num_feat), jnp.float32),
      "v1": 0.5 + jnp.abs(jax.random.normal(keys[5], (1, num_feat), jnp.float32)),
      "w2": 0.3 * jax.random.normal(keys[6], (num_feat, num_feat), jnp.float32),
      "b2": 0.1 * jax.random.normal(keys[7], (1, num_feat), jnp.float32),
      "g2": 1.0 + 0.1 * jax.random.normal(keys[8], (1, num_feat), jnp.float32),
      "be2": 0.1 * jax.random.normal(keys[9], (1, num_feat), jnp.float32),
      "m2": 0.1 * jax.random.normal(keys[10], (1, num_feat), jnp.float32),
      "v2": 0.5 + jnp.abs(jax.random.normal(keys[11], (1, num_feat), jnp.float32)),
  }

  kx, ky, kz, ki = jax.random.split(keys[12], 4)
  xs = jax.random.uniform(kx, (B, Nmax, 1), minval=min_x - 1.0, maxval=max_x + 1.0)
  ys = jax.random.uniform(ky, (B, Nmax, 1), minval=min_y - 1.0, maxval=max_y + 1.0)
  zs = jax.random.uniform(kz, (B, Nmax, 1), minval=-1.0, maxval=2.0)
  its = jax.random.uniform(ki, (B, Nmax, 1))
  lidar = jnp.concatenate([xs, ys, zs, its], axis=-1).astype(jnp.float32)
  num_points = jnp.array([50, 40], jnp.int32)

  canvas, aux = point_pillar_forward(
      lidar, num_points, params,
      min_x=min_x, max_x=max_x, min_y=min_y, max_y=max_y, ppm=ppm)
  canvas = jax.block_until_ready(canvas)

  feat_max = aux["feat_max"]
  seg_id = aux["seg_id"]
  counts = aux["counts"]
  assert int(jnp.max(seg_id)) < feat_max.shape[0]

  # Check the Pallas hot path (MLP + scatter_max) against a pure-JAX reference.
  feat_ref = _mlp_ref(aux["feats"], params)
  feat_max_ref = jax.ops.segment_max(feat_ref, seg_id,
                                     num_segments=feat_max.shape[0])
  has_pts = np.asarray(counts > 0)
  np.testing.assert_allclose(
      np.asarray(feat_max)[has_pts],
      np.asarray(feat_max_ref)[has_pts],
      rtol=1e-4, atol=1e-4)
  assert canvas.shape == (B, num_feat, (max_y - min_y) * ppm,
                          (max_x - min_x) * ppm)
  assert bool(jnp.all(jnp.isfinite(canvas)))

  print("KERNEL_OK")
</pallas_src>

<mosaic_0001>
module attributes {stable_mosaic.version = 11 : i64} {
  func.func @_mlp_kernel(%arg0: i32, %arg1: memref<16x1024xf32, #tpu.memory_space<vmem>>, %arg2: memref<32x16xf32, #tpu.memory_space<vmem>>, %arg3: memref<32x1xf32, #tpu.memory_space<vmem>>, %arg4: memref<32x32xf32, #tpu.memory_space<vmem>>, %arg5: memref<32x1xf32, #tpu.memory_space<vmem>>, %arg6: memref<32x1024xf32, #tpu.memory_space<vmem>>) attributes {dimension_semantics = [#tpu.dimension_semantics<parallel>], iteration_bounds = array<i64: 1>, scalar_prefetch = 0 : i64, scratch_operands = 0 : i64, tpu.core_type = #tpu.core_type<tc>, window_params = [{transform_indices = @transform_0, window_bounds = array<i64: 16, 1024>}, {pipeline_mode = #tpu.pipeline_mode<synchronous>, transform_indices = @transform_1, window_bounds = array<i64: 32, 16>}, {pipeline_mode = #tpu.pipeline_mode<synchronous>, transform_indices = @transform_2, window_bounds = array<i64: 32, 1>}, {pipeline_mode = #tpu.pipeline_mode<synchronous>, transform_indices = @transform_3, window_bounds = array<i64: 32, 32>}, {pipeline_mode = #tpu.pipeline_mode<synchronous>, transform_indices = @transform_4, window_bounds = array<i64: 32, 1>}, {transform_indices = @transform_5, window_bounds = array<i64: 32, 1024>}]} {
    %c0 = arith.constant 0 : index
    %c0_0 = arith.constant 0 : index
    %0 = vector.load %arg2[%c0, %c0_0] : memref<32x16xf32, #tpu.memory_space<vmem>>, vector<32x16xf32>
    %c0_1 = arith.constant 0 : index
    %c0_2 = arith.constant 0 : index
    %1 = vector.load %arg1[%c0_1, %c0_2] : memref<16x1024xf32, #tpu.memory_space<vmem>>, vector<16x1024xf32>
    %cst = arith.constant dense<0.000000e+00> : vector<32x1024xf32>
    %2 = tpu.matmul %0, %1, %cst {dimension_numbers = #tpu.dot_dimension_numbers<[1], [0], [0], [1], [0, 0, 1, 1], [], []>} : vector<32x16xf32>, vector<16x1024xf32>, vector<32x1024xf32> -> vector<32x1024xf32>
    %c0_3 = arith.constant 0 : index
    %c0_4 = arith.constant 0 : index
    %3 = vector.load %arg3[%c0_3, %c0_4] : memref<32x1xf32, #tpu.memory_space<vmem>>, vector<32x1xf32>
    %4 = vector.broadcast %3 : vector<32x1xf32> to vector<32x1024xf32>
    %5 = arith.addf %2, %4 : vector<32x1024xf32>
    %cst_5 = arith.constant 0.000000e+00 : f32
    %6 = vector.broadcast %cst_5 : f32 to vector<32x1024xf32>
    %7 = arith.maximumf %5, %6 : vector<32x1024xf32>
    %c0_6 = arith.constant 0 : index
    %c0_7 = arith.constant 0 : index
    %8 = vector.load %arg4[%c0_6, %c0_7] : memref<32x32xf32, #tpu.memory_space<vmem>>, vector<32x32xf32>
    %cst_8 = arith.constant dense<0.000000e+00> : vector<32x1024xf32>
    %9 = tpu.matmul %8, %7, %cst_8 {dimension_numbers = #tpu.dot_dimension_numbers<[1], [0], [0], [1], [0, 0, 1, 1], [], []>} : vector<32x32xf32>, vector<32x1024xf32>, vector<32x1024xf32> -> vector<32x1024xf32>
    %c0_9 = arith.constant 0 : index
    %c0_10 = arith.constant 0 : index
    %10 = vector.load %arg5[%c0_9, %c0_10] : memref<32x1xf32, #tpu.memory_space<vmem>>, vector<32x1xf32>
    %11 = vector.broadcast %10 : vector<32x1xf32> to vector<32x1024xf32>
    %12 = arith.addf %9, %11 : vector<32x1024xf32>
    %cst_11 = arith.constant 0.000000e+00 : f32
    %13 = vector.broadcast %cst_11 : f32 to vector<32x1024xf32>
    %14 = arith.maximumf %12, %13 : vector<32x1024xf32>
    %c0_12 = arith.constant 0 : index
    %c0_13 = arith.constant 0 : index
    %15 = vector.load %arg6[%c0_12, %c0_13] : memref<32x1024xf32, #tpu.memory_space<vmem>>, vector<32x1024xf32>
    tpu.vector_store %arg6[%c0_12, %c0_13], %14 {strides = array<i32>} : memref<32x1024xf32, #tpu.memory_space<vmem>>, vector<32x1024xf32>,
    return
  }
  func.func @transform_0(%arg0: i32) -> (i32, i32) {
    %c0_i32 = arith.constant 0 : i32
    %c0_i32_0 = arith.constant 0 : i32
    return %c0_i32, %arg0 : i32, i32
  }
  func.func @transform_1(%arg0: i32) -> (i32, i32) {
    %c0_i32 = arith.constant 0 : i32
    %c0_i32_0 = arith.constant 0 : i32
    %c0_i32_1 = arith.constant 0 : i32
    return %c0_i32, %c0_i32_0 : i32, i32
  }
  func.func @transform_2(%arg0: i32) -> (i32, i32) {
    %c0_i32 = arith.constant 0 : i32
    %c0_i32_0 = arith.constant 0 : i32
    %c0_i32_1 = arith.constant 0 : i32
    return %c0_i32, %c0_i32_0 : i32, i32
  }
  func.func @transform_3(%arg0: i32) -> (i32, i32) {
    %c0_i32 = arith.constant 0 : i32
    %c0_i32_0 = arith.constant 0 : i32
    %c0_i32_1 = arith.constant 0 : i32
    return %c0_i32, %c0_i32_0 : i32, i32
  }
  func.func @transform_4(%arg0: i32) -> (i32, i32) {
    %c0_i32 = arith.constant 0 : i32
    %c0_i32_0 = arith.constant 0 : i32
    %c0_i32_1 = arith.constant 0 : i32
    return %c0_i32, %c0_i32_0 : i32, i32
  }
  func.func @transform_5(%arg0: i32) -> (i32, i32) {
    %c0_i32 = arith.constant 0 : i32
    %c0_i32_0 = arith.constant 0 : i32
    return %c0_i32, %arg0 : i32, i32
  }
}

</mosaic_0001>

<bundles_post_ra>
// kernel: tpu_custom_call.1
= control target key start
LH: loop header
LB: loop body
LE: loop exit
PB: predicated region body
PF: predicated region fallthrough
CT: control target
= control target key end

     0   :  { %10 = vsyncpa [#allocation3], 0  ;;  %s1312_s0 = inlined_call_operand.hbm [shape: f32[16,1024], index: 0, kind: input, shape index: {}]   ;;  %s1313_s1 = inlined_call_operand.vmem [shape: f32[32,16], index: 1, kind: input, shape index: {}]   ;;  %s1314_s2 = inlined_call_operand.vmem [shape: f32[32,1], index: 2, kind: input, shape index: {}]   ;;  %s1315_s3 = inlined_call_operand.vmem [shape: f32[32,32], index: 3, kind: input, shape index: {}]   ;;  %s1316_s4 = inlined_call_operand.vmem [shape: f32[32,1], index: 4, kind: input, shape index: {}]   ;;  %s1317_s5 = inlined_call_operand.hbm [shape: f32[32,1024], index: 5, kind: output, shape index: {}]  }
   0x1   :  { %11 = vsyncpa [#allocation4], 0  ;;  %s1042_s18 = smov [#allocation2]  }
   0x2   :  { %s17_s19 = sshll.u32 %s1042_s18, 4  ;;  %s18_s19 = int_to_ptr.vmem [resolvable:$true] %s17_s19 }
   0x3   :  { %s1006_s20 = scalar_lea.vmem %s18_s19, 2048  ;;  %p1011_p1 = scmp.lt.s32.totalorder %s18_s19, %s18_s19 }
   0x4   :  { %p1007_p0 = scmp.ne.s32.totalorder %s18_s19, %s1006_s20  ;;  %p1012_p2 = scmp.lt.s32.totalorder %s1006_s20, %s1006_s20 }
   0x6   :  { %p1013_p3 = por %p1012_p2, %p1011_p1 }
   0x8   :  { %p1014_p4 = pnand %p1013_p3, %p1007_p0 }
   0xa   :  { %1017 = shalt.err (!%p1014_p4)
}
   0xb   :  { %s1043_s21 = smov 1024   ;;  %s1044_s22 = smov 64  }
   0xc   :  { %23 = dma.hbm_to_vmem [thread:$0]  %s1312_s0, 2048, %s18_s19, [#allocation3], %s1043_s21, %s1043_s21, %s1044_s22  }
   0xd   :  { %1038 = dma.done.wait [#allocation3], 2048  }
   0xe   :  { %1039 = vsyncadd [#allocation3], 4294965248  ;;  %v1045_v0 = vmov 0.0   ;;  %v1046_v1 = vmov 0   ;;  %v48_v2 = vld [vmem:[#allocation2 + $0x48] sm:$0xff]  ;;  %v50_v3 = vld [vmem:[#allocation2 + $0x58] sm:$0xff] }
   0xf   :  { %156 = vmatprep.mubr.f32.mxu0 %v1045_v0  ;;  %245 = vmatprep.mubr.f32.mxu1 %v1045_v0  ;;  %v47_v4 = vld [vmem:[#allocation2 + $0x40] sm:$0xff]  ;;  %v49_v5 = vld [vmem:[#allocation2 + $0x50] sm:$0xff]  ;;  %v40_v6 = vld [vmem:[#allocation2 + $0x8] sm:$0xff]  ;;  %vm79_vm0 = vcmask 130048   ;;  %vm508_vm1 = vcmask 261120  }
  0x10   :  { %997 = vset.pattern.permute.xlu1 %v1046_v1  ;;  %996 = vset.pattern.permute.xlu0 %v1046_v1  ;;  %v42_v7 = vld [vmem:[#allocation2 + $0x18] sm:$0xff]  ;;  %v39_v8 = vld [vmem:[#allocation2] sm:$0xff]  ;;  %v41_v9 = vld [vmem:[#allocation2 + $0x10] sm:$0xff] }
  0x11   :  { %120 = vmatprep.subr.mxu0 %v48_v2  ;;  %209 = vmatprep.subr.mxu1 %v50_v3  ;;  %v35_v10 = vld [vmem:[%s1313_s1] sm:$0xff]  ;;  %v52_v11 = vld [vmem:[#allocation2 + $0x68] sm:$0xff]  ;;  %v54_v12 = vld [vmem:[#allocation2 + $0x78] sm:$0xff] }
  0x12   :  { %121 = vmatpush1.msra.mxu0 %v47_v4  ;;  %210 = vmatpush1.msra.mxu1 %v49_v5  ;;  %v51_v13 = vld [vmem:[#allocation2 + $0x60] sm:$0xff]  ;;  %v53_v14 = vld [vmem:[#allocation2 + $0x70] sm:$0xff]  ;;  %v36_v15 = vld [vmem:[%s1313_s1 + $0x8] sm:$0xff] }
  0x13   :  { %122 = vmatprep.subr.mxu0 %v40_v6  ;;  %211 = vmatprep.subr.mxu1 %v42_v7  ;;  %v44_v16 = vld [vmem:[#allocation2 + $0x28] sm:$0xff]  ;;  %v46_v17 = vld [vmem:[#allocation2 + $0x38] sm:$0xff]  ;;  %v43_v18 = vld [vmem:[#allocation2 + $0x20] sm:$0xff] }
  0x14   :  { %123 = vmatpush1.msra.mxu0 %v39_v8  ;;  %212 = vmatpush1.msra.mxu1 %v41_v9  ;;  %v45_v19 = vld [vmem:[#allocation2 + $0x30] sm:$0xff]  ;;  %v56_v21 = vld [vmem:[%s1314_s2 + $0x8] sm:$0xff]  ;;  %v58_v22 = vld [vmem:[%s1314_s2 + $0x18] sm:$0xff] }
  0x15   :  { %958 = vmatmul.mubr.msk.f32.vlgmr.msra.gmra.mxu0 %vm79_vm0, %v35_v10  ;;  %962 = vmatmul.mubr.msk.f32.vlgmr.msra.gmra.mxu1 %vm79_vm0, %v35_v10  ;;  %v37_v20 = vld [vmem:[%s1313_s1 + $0x10] sm:$0xff]  ;;  %v38_v23 = vld [vmem:[%s1313_s1 + $0x18] sm:$0xff]  ;;  %v55_v24 = vld [vmem:[%s1314_s2] sm:$0xff] }
  0x16   :  { %162 = vmatprep.mubr.f32.mxu0 %v1045_v0  ;;  %251 = vmatprep.mubr.f32.mxu1 %v1045_v0  ;;  %v57_v25 = vld [vmem:[%s1314_s2 + $0x10] sm:$0xff]  ;;  %v484_v26 = vld [vmem:[%s1316_s4] sm:$0xff]  ;;  %v485_v27 = vld [vmem:[%s1316_s4 + $0x8] sm:$0xff] }
  0x17   :  { %298 = vmatprep.subr.mxu0 %v52_v11  ;;  %387 = vmatprep.subr.mxu1 %v54_v12  ;;  %v486_v28 = vld [vmem:[%s1316_s4 + $0x10] sm:$0xff]  ;;  %v487_v29 = vld [vmem:[%s1316_s4 + $0x18] sm:$0xff] }
  0x18   :  { %299 = vmatpush1.msra.mxu0 %v51_v13  ;;  %388 = vmatpush1.msra.mxu1 %v53_v14 }
  0x19   :  { %959 = vmatmul.mubr.msk.f32.gmra.mxu0 %vm79_vm0, %v36_v15  ;;  %963 = vmatmul.mubr.msk.f32.gmra.mxu1 %vm79_vm0, %v36_v15 }
  0x1a   :  { %168 = vmatprep.mubr.f32.mxu0 %v1045_v0  ;;  %257 = vmatprep.mubr.f32.mxu1 %v1045_v0 }
  0x1b   :  { %300 = vmatprep.subr.mxu0 %v44_v16  ;;  %389 = vmatprep.subr.mxu1 %v46_v17 }
  0x1c   :  { %301 = vmatpush1.msra.mxu0 %v43_v18  ;;  %390 = vmatpush1.msra.mxu1 %v45_v19 }
  0x1d   :  { %960 = vmatmul.mubr.msk.f32.gmra.mxu0 %vm79_vm0, %v37_v20  ;;  %964 = vmatmul.mubr.msk.f32.gmra.mxu1 %vm79_vm0, %v37_v20 }
  0x1e   :  { %174 = vmatprep.mubr.f32.mxu0 %v1045_v0  ;;  %263 = vmatprep.mubr.f32.mxu1 %v1045_v0 }
  0x1f   :  { %66 = vperm.xlu1 %997, %v56_v21   ;;  %76 = vperm.xlu0 %996, %v58_v22  }
  0x21   :  { %961 = vmatmul.mubr.msk.f32.gmra.mxu0 %vm79_vm0, %v38_v23  ;;  %965 = vmatmul.mubr.msk.f32.gmra.mxu1 %vm79_vm0, %v38_v23 }
  0x22   :  { %334 = vmatprep.mubr.f32.mxu0 %v1045_v0  ;;  %423 = vmatprep.mubr.f32.mxu1 %v1045_v0 }
  0x23   :  { %61 = vperm.xlu1 %997, %v55_v24   ;;  %71 = vperm.xlu0 %996, %v57_v25  }
  0x25   :  { %966 = vmatmul.mubr.msk.f32.vlgmr.msra.gmra.mxu0 %vm79_vm0, %v35_v10  ;;  %970 = vmatmul.mubr.msk.f32.vlgmr.msra.gmra.mxu1 %vm79_vm0, %v35_v10 }
  0x26   :  { %340 = vmatprep.mubr.f32.mxu0 %v1045_v0  ;;  %429 = vmatprep.mubr.f32.mxu1 %v1045_v0 }
  0x27   :  { %490 = vperm.xlu0 %996, %v484_v26   ;;  %495 = vperm.xlu1 %997, %v485_v27  }
  0x29   :  { %967 = vmatmul.mubr.msk.f32.gmra.mxu0 %vm79_vm0, %v36_v15  ;;  %971 = vmatmul.mubr.msk.f32.gmra.mxu1 %vm79_vm0, %v36_v15 }
  0x2a   :  { %346 = vmatprep.mubr.f32.mxu0 %v1045_v0  ;;  %435 = vmatprep.mubr.f32.mxu1 %v1045_v0 }
  0x2b   :  { %500 = vperm.xlu0 %996, %v486_v28   ;;  %505 = vperm.xlu1 %997, %v487_v29   ;;  %v1193_v29 = vld [vmem:[%s1315_s3] sm:$0xff] }
  0x2d   :  { %968 = vmatmul.mubr.msk.f32.gmra.mxu0 %vm79_vm0, %v37_v20  ;;  %972 = vmatmul.mubr.msk.f32.gmra.mxu1 %vm79_vm0, %v37_v20 }
  0x2e   :  { %352 = vmatprep.mubr.f32.mxu0 %v1045_v0  ;;  %441 = vmatprep.mubr.f32.mxu1 %v1045_v0 }
  0x31   :  { %969 = vmatmul.mubr.msk.f32.gmra.mxu0 %vm79_vm0, %v38_v23  ;;  %973 = vmatmul.mubr.msk.f32.gmra.mxu1 %vm79_vm0, %v38_v23 }
  0x32   :  { %585 = vmatprep.mubr.f32.mxu0 %v1045_v0  ;;  %674 = vmatprep.mubr.f32.mxu1 %v1045_v0 }
  0x9a   :  { %v1154_v38 = vpop.permute.xlu0 %76  ;;  %v1156_v43 = vpop.permute.xlu1 %66 }
  0x9e   :  { %v1158_v46 = vpop.permute.xlu0 %71  ;;  %v1172_v59 = vpop.permute.xlu1 %61 }
  0xd5   :  { %v158_v30 = vpop.f32.mrf.mxu0  ;;  %v247_v31 = vpop.f32.mrf.mxu1 }
  0xd6   :  { %v159_v11 = vadd.f32 %v158_v30, %v1172_v59  ;;  %v248_v12 = vadd.f32 %v247_v31, %v1172_v59 }
  0xd7   :  { %v160_v32 = vpop.f32.mrf.mxu0  ;;  %v249_v33 = vpop.f32.mrf.mxu1 }
  0xd8   :  { %v161_v7 = vadd.f32 %v160_v32, %v1172_v59  ;;  %v250_v8 = vadd.f32 %v249_v33, %v1172_v59  ;;  %v448_v25 = vmax.f32 %v159_v11, 0.0  ;;  %v450_v26 = vmax.f32 %v248_v12, 0.0 }
  0xd9   :  { %v164_v34 = vpop.f32.mrf.mxu0  ;;  %v253_v35 = vpop.f32.mrf.mxu1 }
  0xda   :  { %v165_v1 = vadd.f32 %v164_v34, %v1156_v43  ;;  %v254_v2 = vadd.f32 %v253_v35, %v1156_v43  ;;  %v449_v23 = vmax.f32 %v161_v7, 0.0  ;;  %v451_v24 = vmax.f32 %v250_v8, 0.0  ;;  %v1204_v34 = vld [vmem:[%s1315_s3 + $0x8] sm:$0xff] }
  0xdb   :  { %v166_v36 = vpop.f32.mrf.mxu0  ;;  %v255_v37 = vpop.f32.mrf.mxu1 }
  0xdc   :  { %v167_v60 = vadd.f32 %v166_v36, %v1156_v43  ;;  %v256_v61 = vadd.f32 %v255_v37, %v1156_v43  ;;  %v456_v19 = vmax.f32 %v165_v1, 0.0  ;;  %v458_v20 = vmax.f32 %v254_v2, 0.0  ;;  %v483_v1 = vld [vmem:[%s1315_s3 + $0x18] sm:$0xff] }
  0xdd   :  { %v170_v39 = vpop.f32.mrf.mxu0  ;;  %v259_v40 = vpop.f32.mrf.mxu1 }
  0xde   :  { %v171_v55 = vadd.f32 %v170_v39, %v1158_v46  ;;  %v260_v56 = vadd.f32 %v259_v40, %v1158_v46  ;;  %v457_v17 = vmax.f32 %v167_v60, 0.0  ;;  %v459_v18 = vmax.f32 %v256_v61, 0.0 }
  0xdf   :  { %v172_v41 = vpop.f32.mrf.mxu0  ;;  %v261_v42 = vpop.f32.mrf.mxu1 }
  0xe0   :  { %v173_v51 = vadd.f32 %v172_v41, %v1158_v46  ;;  %v262_v52 = vadd.f32 %v261_v42, %v1158_v46  ;;  %v464_v13 = vmax.f32 %v171_v55, 0.0  ;;  %v466_v14 = vmax.f32 %v260_v56, 0.0 }
  0xe1   :  { %v176_v44 = vpop.f32.mrf.mxu0  ;;  %v265_v45 = vpop.f32.mrf.mxu1 }
  0xe2   :  { %v177_v47 = vadd.f32 %v176_v44, %v1154_v38  ;;  %v266_v48 = vadd.f32 %v265_v45, %v1154_v38  ;;  %v465_v9 = vmax.f32 %v173_v51, 0.0  ;;  %v467_v10 = vmax.f32 %v262_v52, 0.0  ;;  %v482_v45 = vld [vmem:[%s1315_s3 + $0x10] sm:$0xff]  ;;  %s1047_s3 = smov [#allocation5]  }
  0xe3   :  { %v178_v49 = vpop.f32.mrf.mxu0  ;;  %v267_v50 = vpop.f32.mrf.mxu1  ;;  %s946_s29 = sshll.u32 %s1047_s3, 4  ;;  %s947_s29 = int_to_ptr.vmem [resolvable:$true] %s946_s29 }
  0xe4   :  { %v179_v53 = vadd.f32 %v178_v49, %v1154_v38  ;;  %v268_v54 = vadd.f32 %v267_v50, %v1154_v38  ;;  %v472_v3 = vmax.f32 %v177_v47, 0.0  ;;  %v474_v4 = vmax.f32 %v266_v48, 0.0  ;;  %s1018_s30 = scalar_lea.vmem %s947_s29, 4096  ;;  %p1023_p6 = scmp.lt.s32.totalorder %s947_s29, %s947_s29 }
  0xe5   :  { %v1168_v57 = vpop.f32.mrf.mxu0  ;;  %v1170_v58 = vpop.f32.mrf.mxu1  ;;  %p1019_p5 = scmp.ne.s32.totalorder %s947_s29, %s1018_s30  ;;  %p1024_p7 = scmp.lt.s32.totalorder %s1018_s30, %s1018_s30 }
  0xe6   :  { %v473_v62 = vmax.f32 %v179_v53, 0.0  ;;  %v475_v63 = vmax.f32 %v268_v54, 0.0  ;;  %v337_v2 = vadd.f32 %v1168_v57, %v1172_v59 }
  0xe7   :  { %v1178_v5 = vpop.f32.mrf.mxu0  ;;  %v1180_v6 = vpop.f32.mrf.mxu1  ;;  %p1025_p8 = por %p1024_p7, %p1023_p6 }
  0xe8   :  { %545 = vmatprep.subr.mxu0 %v473_v62  ;;  %634 = vmatprep.subr.mxu1 %v475_v63  ;;  %v339_v60 = vadd.f32 %v1178_v5, %v1172_v59  ;;  %v428_v61 = vadd.f32 %v1180_v6, %v1172_v59  ;;  %v452_v57 = vmax.f32 %v337_v2, 0.0 }
  0xe9   :  { %v1186_v15 = vpop.f32.mrf.mxu0  ;;  %v1188_v16 = vpop.f32.mrf.mxu1  ;;  %546 = vmatpush1.msra.mxu0 %v472_v3  ;;  %635 = vmatpush1.msra.mxu1 %v474_v4  ;;  %p1026_p9 = pnand %p1025_p8, %p1019_p5 }
  0xea   :  { %547 = vmatprep.subr.mxu0 %v465_v9  ;;  %636 = vmatprep.subr.mxu1 %v467_v10  ;;  %v343_v56 = vadd.f32 %v1186_v15, %v1156_v43  ;;  %v453_v7 = vmax.f32 %v339_v60, 0.0  ;;  %v455_v8 = vmax.f32 %v428_v61, 0.0  ;;  %v1270_v15 = vpop.permute.xlu1 %495 }
  0xeb   :  { %v344_v21 = vpop.f32.mrf.mxu0  ;;  %v433_v22 = vpop.f32.mrf.mxu1  ;;  %548 = vmatpush1.msra.mxu0 %v464_v13  ;;  %637 = vmatpush1.msra.mxu1 %v466_v14 }
  0xec   :  { %549 = vmatprep.subr.mxu0 %v457_v17  ;;  %638 = vmatprep.subr.mxu1 %v459_v18  ;;  %v345_v52 = vadd.f32 %v344_v21, %v1156_v43  ;;  %v434_v53 = vadd.f32 %v433_v22, %v1156_v43  ;;  %v460_v5 = vmax.f32 %v343_v56, 0.0 }
  0xed   :  { %v348_v27 = vpop.f32.mrf.mxu0  ;;  %v437_v28 = vpop.f32.mrf.mxu1  ;;  %550 = vmatpush1.msra.mxu0 %v456_v19  ;;  %639 = vmatpush1.msra.mxu1 %v458_v20 }
  0xee   :  { %551 = vmatprep.subr.mxu0 %v449_v23  ;;  %640 = vmatprep.subr.mxu1 %v451_v24  ;;  %v349_v48 = vadd.f32 %v348_v27, %v1158_v46  ;;  %v438_v49 = vadd.f32 %v437_v28, %v1158_v46  ;;  %v461_v3 = vmax.f32 %v345_v52, 0.0  ;;  %v463_v4 = vmax.f32 %v434_v53, 0.0 }
  0xef   :  { %v350_v30 = vpop.f32.mrf.mxu0  ;;  %v439_v31 = vpop.f32.mrf.mxu1  ;;  %552 = vmatpush1.msra.mxu0 %v448_v25  ;;  %641 = vmatpush1.msra.mxu1 %v450_v26 }
  0xf0   :  { %974 = vmatmul.mubr.msk.f32.vlgmr.msra.gmra.mxu0 %vm508_vm1, %v1193_v29  ;;  %978 = vmatmul.mubr.msk.f32.vlgmr.msra.gmra.mxu1 %vm508_vm1, %v1193_v29  ;;  %v351_v42 = vadd.f32 %v350_v30, %v1158_v46  ;;  %v440_v44 = vadd.f32 %v439_v31, %v1158_v46  ;;  %v432_v46 = vadd.f32 %v1188_v16, %v1156_v43  ;;  %v468_v62 = vmax.f32 %v349_v48, 0.0 }
  0xf1   :  { %v354_v32 = vpop.f32.mrf.mxu0  ;;  %v443_v33 = vpop.f32.mrf.mxu1  ;;  %591 = vmatprep.mubr.f32.mxu0 %v1045_v0  ;;  %680 = vmatprep.mubr.f32.mxu1 %v1045_v0  ;;  %v470_v63 = vmax.f32 %v438_v49, 0.0  ;;  %v426_v43 = vadd.f32 %v1170_v58, %v1172_v59 }
  0xf2   :  { %v355_v35 = vadd.f32 %v354_v32, %v1154_v38  ;;  %v444_v39 = vadd.f32 %v443_v33, %v1154_v38  ;;  %v469_v54 = vmax.f32 %v351_v42, 0.0  ;;  %v471_v55 = vmax.f32 %v440_v44, 0.0  ;;  %v1266_v58 = vpop.permute.xlu0 %490 }
  0xf3   :  { %v356_v36 = vpop.f32.mrf.mxu0  ;;  %v445_v37 = vpop.f32.mrf.mxu1  ;;  %v462_v6 = vmax.f32 %v432_v46, 0.0  ;;  %v454_v9 = vmax.f32 %v426_v43, 0.0 }
  0xf4   :  { %v357_v40 = vadd.f32 %v356_v36, %v1154_v38  ;;  %v446_v41 = vadd.f32 %v445_v37, %v1154_v38  ;;  %975 = vmatmul.mubr.msk.f32.gmra.mxu0 %vm508_vm1, %v1204_v34  ;;  %979 = vmatmul.mubr.msk.f32.gmra.mxu1 %vm508_vm1, %v1204_v34  ;;  %v476_v50 = vmax.f32 %v355_v35, 0.0  ;;  %v478_v51 = vmax.f32 %v444_v39, 0.0 }
  0xf5   :  { %597 = vmatprep.mubr.f32.mxu0 %v1045_v0  ;;  %686 = vmatprep.mubr.f32.mxu1 %v1045_v0 }
  0xf6   :  { %v477_v47 = vmax.f32 %v357_v40, 0.0  ;;  %v479_v38 = vmax.f32 %v446_v41, 0.0  ;;  %v1276_v27 = vpop.permute.xlu0 %500 }
  0xf8   :  { %976 = vmatmul.mubr.msk.f32.gmra.mxu0 %vm508_vm1, %v482_v45  ;;  %980 = vmatmul.mubr.msk.f32.gmra.mxu1 %vm508_vm1, %v482_v45 }
  0xf9   :  { %723 = vmatprep.subr.mxu0 %v477_v47  ;;  %812 = vmatprep.subr.mxu1 %v479_v38  ;;  %v1284_v47 = vpop.permute.xlu1 %505 }
  0xfa   :  { %724 = vmatpush1.msra.mxu0 %v476_v50  ;;  %813 = vmatpush1.msra.mxu1 %v478_v51 }
  0xfb   :  { %725 = vmatprep.subr.mxu0 %v469_v54  ;;  %814 = vmatprep.subr.mxu1 %v471_v55 }
  0xfc   :  { %603 = vmatprep.mubr.f32.mxu0 %v1045_v0  ;;  %692 = vmatprep.mubr.f32.mxu1 %v1045_v0 }
  0xfd   :  { %726 = vmatpush1.msra.mxu0 %v468_v62  ;;  %815 = vmatpush1.msra.mxu1 %v470_v63 }
  0xfe   :  { %977 = vmatmul.mubr.msk.f32.gmra.mxu0 %vm508_vm1, %v483_v1  ;;  %981 = vmatmul.mubr.msk.f32.gmra.mxu1 %vm508_vm1, %v483_v1 }
  0xff   :  { %727 = vmatprep.subr.mxu0 %v461_v3  ;;  %816 = vmatprep.subr.mxu1 %v463_v4 }
 0x100   :  { %728 = vmatpush1.msra.mxu0 %v460_v5  ;;  %817 = vmatpush1.msra.mxu1 %v462_v6 }
 0x101   :  { %729 = vmatprep.subr.mxu0 %v453_v7  ;;  %818 = vmatprep.subr.mxu1 %v455_v8 }
 0x102   :  { %730 = vmatpush1.msra.mxu0 %v452_v57  ;;  %763 = vmatprep.mubr.f32.mxu0 %v1045_v0 }
 0x103   :  { %819 = vmatpush1.msra.mxu1 %v454_v9  ;;  %852 = vmatprep.mubr.f32.mxu1 %v1045_v0 }
 0x104   :  { %982 = vmatmul.mubr.msk.f32.vlgmr.msra.gmra.mxu0 %vm508_vm1, %v1193_v29  ;;  %986 = vmatmul.mubr.msk.f32.vlgmr.msra.gmra.mxu1 %vm508_vm1, %v1193_v29 }
 0x105   :  { %769 = vmatprep.mubr.f32.mxu0 %v1045_v0  ;;  %858 = vmatprep.mubr.f32.mxu1 %v1045_v0 }
 0x108   :  { %983 = vmatmul.mubr.msk.f32.gmra.mxu0 %vm508_vm1, %v1204_v34  ;;  %987 = vmatmul.mubr.msk.f32.gmra.mxu1 %vm508_vm1, %v1204_v34 }
 0x109   :  { %775 = vmatprep.mubr.f32.mxu0 %v1045_v0  ;;  %864 = vmatprep.mubr.f32.mxu1 %v1045_v0 }
 0x10c   :  { %984 = vmatmul.mubr.msk.f32.gmra.mxu0 %vm508_vm1, %v482_v45  ;;  %988 = vmatmul.mubr.msk.f32.gmra.mxu1 %vm508_vm1, %v482_v45 }
 0x10d   :  { %781 = vmatprep.mubr.f32.mxu0 %v1045_v0  ;;  %870 = vmatprep.mubr.f32.mxu1 %v1045_v0 }
 0x110   :  { %985 = vmatmul.mubr.msk.f32.gmra.mxu0 %vm508_vm1, %v483_v1  ;;  %989 = vmatmul.mubr.msk.f32.gmra.mxu1 %vm508_vm1, %v483_v1 }
 0x1b0   :  { %v587_v59 = vpop.f32.mrf.mxu0  ;;  %v676_v10 = vpop.f32.mrf.mxu1 }
 0x1b1   :  { %v588_v11 = vadd.f32 %v587_v59, %v1266_v58  ;;  %v677_v12 = vadd.f32 %v676_v10, %v1266_v58 }
 0x1b2   :  { %v589_v13 = vpop.f32.mrf.mxu0  ;;  %v678_v14 = vpop.f32.mrf.mxu1 }
 0x1b3   :  { %v877_v16 = vmax.f32 %v588_v11, 0.0  ;;  %v879_v17 = vmax.f32 %v677_v12, 0.0  ;;  %v590_v0 = vadd.f32 %v589_v13, %v1266_v58  ;;  %v679_v18 = vadd.f32 %v678_v14, %v1266_v58 }
 0x1b4   :  { %v593_v19 = vpop.f32.mrf.mxu0  ;;  %v682_v20 = vpop.f32.mrf.mxu1 }
 0x1b5   :  { %909 = vst [vmem:[#allocation5] sm:$0xff] %v877_v16  ;;  %911 = vst [vmem:[#allocation5 + $0x10] sm:$0xff] %v879_v17  ;;  %v878_v21 = vmax.f32 %v590_v0, 0.0  ;;  %v880_v22 = vmax.f32 %v679_v18, 0.0  ;;  %v594_v23 = vadd.f32 %v593_v19, %v1270_v15  ;;  %v683_v24 = vadd.f32 %v682_v20, %v1270_v15 }
 0x1b6   :  { %v595_v25 = vpop.f32.mrf.mxu0  ;;  %v684_v26 = vpop.f32.mrf.mxu1 }
 0x1b7   :  { %910 = vst [vmem:[#allocation5 + $0x8] sm:$0xff] %v878_v21  ;;  %912 = vst [vmem:[#allocation5 + $0x18] sm:$0xff] %v880_v22  ;;  %v885_v28 = vmax.f32 %v594_v23, 0.0  ;;  %v887_v29 = vmax.f32 %v683_v24, 0.0  ;;  %v596_v30 = vadd.f32 %v595_v25, %v1270_v15  ;;  %v685_v31 = vadd.f32 %v684_v26, %v1270_v15 }
 0x1b8   :  { %v599_v32 = vpop.f32.mrf.mxu0  ;;  %v688_v33 = vpop.f32.mrf.mxu1 }
 0x1b9   :  { %917 = vst [vmem:[#allocation5 + $0x40] sm:$0xff] %v885_v28  ;;  %919 = vst [vmem:[#allocation5 + $0x50] sm:$0xff] %v887_v29  ;;  %v886_v34 = vmax.f32 %v596_v30, 0.0  ;;  %v888_v35 = vmax.f32 %v685_v31, 0.0  ;;  %v600_v36 = vadd.f32 %v599_v32, %v1276_v27  ;;  %v689_v37 = vadd.f32 %v688_v33, %v1276_v27 }
 0x1ba   :  { %v601_v39 = vpop.f32.mrf.mxu0  ;;  %v690_v40 = vpop.f32.mrf.mxu1 }
 0x1bb   :  { %918 = vst [vmem:[#allocation5 + $0x48] sm:$0xff] %v886_v34  ;;  %920 = vst [vmem:[#allocation5 + $0x58] sm:$0xff] %v888_v35  ;;  %v893_v41 = vmax.f32 %v600_v36, 0.0  ;;  %v895_v42 = vmax.f32 %v689_v37, 0.0  ;;  %v602_v44 = vadd.f32 %v601_v39, %v1276_v27  ;;  %v691_v45 = vadd.f32 %v690_v40, %v1276_v27 }
 0x1bd   :  { %925 = vst [vmem:[#allocation5 + $0x80] sm:$0xff] %v893_v41  ;;  %927 = vst [vmem:[#allocation5 + $0x90] sm:$0xff] %v895_v42  ;;  %v894_v38 = vmax.f32 %v602_v44, 0.0  ;;  %v896_v48 = vmax.f32 %v691_v45, 0.0 }
 0x1be   :  { %v605_v49 = vpop.f32.mrf.mxu0  ;;  %v694_v50 = vpop.f32.mrf.mxu1 }
 0x1bf   :  { %926 = vst [vmem:[#allocation5 + $0x88] sm:$0xff] %v894_v38  ;;  %928 = vst [vmem:[#allocation5 + $0x98] sm:$0xff] %v896_v48  ;;  %v606_v51 = vadd.f32 %v605_v49, %v1284_v47  ;;  %v695_v52 = vadd.f32 %v694_v50, %v1284_v47 }
 0x1c0   :  { %v607_v53 = vpop.f32.mrf.mxu0  ;;  %v696_v54 = vpop.f32.mrf.mxu1 }
 0x1c1   :  { %v901_v55 = vmax.f32 %v606_v51, 0.0  ;;  %v903_v56 = vmax.f32 %v695_v52, 0.0  ;;  %v608_v46 = vadd.f32 %v607_v53, %v1284_v47  ;;  %v697_v60 = vadd.f32 %v696_v54, %v1284_v47 }
 0x1c3   :  { %933 = vst [vmem:[#allocation5 + $0xc0] sm:$0xff] %v901_v55  ;;  %935 = vst [vmem:[#allocation5 + $0xd0] sm:$0xff] %v903_v56  ;;  %v902_v61 = vmax.f32 %v608_v46, 0.0  ;;  %v904_v62 = vmax.f32 %v697_v60, 0.0 }
 0x1c4   :  { %v765_v63 = vpop.f32.mrf.mxu0  ;;  %v854_v1 = vpop.f32.mrf.mxu1 }
 0x1c5   :  { %934 = vst [vmem:[#allocation5 + $0xc8] sm:$0xff] %v902_v61  ;;  %936 = vst [vmem:[#allocation5 + $0xd8] sm:$0xff] %v904_v62  ;;  %v766_v2 = vadd.f32 %v765_v63, %v1266_v58  ;;  %v855_v43 = vadd.f32 %v854_v1, %v1266_v58 }
 0x1c6   :  { %v767_v3 = vpop.f32.mrf.mxu0  ;;  %v856_v4 = vpop.f32.mrf.mxu1 }
 0x1c7   :  { %v881_v5 = vmax.f32 %v766_v2, 0.0  ;;  %v883_v6 = vmax.f32 %v855_v43, 0.0  ;;  %v768_v7 = vadd.f32 %v767_v3, %v1266_v58  ;;  %v857_v8 = vadd.f32 %v856_v4, %v1266_v58 }
 0x1c8   :  { %v771_v57 = vpop.f32.mrf.mxu0  ;;  %v860_v9 = vpop.f32.mrf.mxu1 }
 0x1c9   :  { %913 = vst [vmem:[#allocation5 + $0x20] sm:$0xff] %v881_v5  ;;  %915 = vst [vmem:[#allocation5 + $0x30] sm:$0xff] %v883_v6  ;;  %v882_v59 = vmax.f32 %v768_v7, 0.0  ;;  %v884_v10 = vmax.f32 %v857_v8, 0.0  ;;  %v772_v11 = vadd.f32 %v771_v57, %v1270_v15  ;;  %v861_v12 = vadd.f32 %v860_v9, %v1270_v15 }
 0x1ca   :  { %v773_v13 = vpop.f32.mrf.mxu0  ;;  %v862_v14 = vpop.f32.mrf.mxu1 }
 0x1cb   :  { %914 = vst [vmem:[#allocation5 + $0x28] sm:$0xff] %v882_v59  ;;  %916 = vst [vmem:[#allocation5 + $0x38] sm:$0xff] %v884_v10  ;;  %v889_v16 = vmax.f32 %v772_v11, 0.0  ;;  %v891_v17 = vmax.f32 %v861_v12, 0.0  ;;  %v774_v0 = vadd.f32 %v773_v13, %v1270_v15  ;;  %v863_v58 = vadd.f32 %v862_v14, %v1270_v15 }
 0x1cc   :  { %v777_v18 = vpop.f32.mrf.mxu0  ;;  %v866_v19 = vpop.f32.mrf.mxu1 }
 0x1cd   :  { %921 = vst [vmem:[#allocation5 + $0x60] sm:$0xff] %v889_v16  ;;  %923 = vst [vmem:[#allocation5 + $0x70] sm:$0xff] %v891_v17  ;;  %v890_v20 = vmax.f32 %v774_v0, 0.0  ;;  %v892_v21 = vmax.f32 %v863_v58, 0.0  ;;  %v778_v22 = vadd.f32 %v777_v18, %v1276_v27  ;;  %v867_v23 = vadd.f32 %v866_v19, %v1276_v27 }
 0x1ce   :  { %v779_v24 = vpop.f32.mrf.mxu0  ;;  %v868_v25 = vpop.f32.mrf.mxu1 }
 0x1cf   :  { %922 = vst [vmem:[#allocation5 + $0x68] sm:$0xff] %v890_v20  ;;  %924 = vst [vmem:[#allocation5 + $0x78] sm:$0xff] %v892_v21  ;;  %v897_v26 = vmax.f32 %v778_v22, 0.0  ;;  %v899_v28 = vmax.f32 %v867_v23, 0.0  ;;  %v780_v29 = vadd.f32 %v779_v24, %v1276_v27  ;;  %v869_v15 = vadd.f32 %v868_v25, %v1276_v27 }
 0x1d0   :  { %v783_v30 = vpop.f32.mrf.mxu0  ;;  %v872_v31 = vpop.f32.mrf.mxu1 }
 0x1d1   :  { %929 = vst [vmem:[#allocation5 + $0xa0] sm:$0xff] %v897_v26  ;;  %931 = vst [vmem:[#allocation5 + $0xb0] sm:$0xff] %v899_v28  ;;  %v898_v32 = vmax.f32 %v780_v29, 0.0  ;;  %v900_v33 = vmax.f32 %v869_v15, 0.0  ;;  %v784_v34 = vadd.f32 %v783_v30, %v1284_v47  ;;  %v873_v35 = vadd.f32 %v872_v31, %v1284_v47 }
 0x1d2   :  { %v785_v36 = vpop.f32.mrf.mxu0  ;;  %v874_v37 = vpop.f32.mrf.mxu1 }
 0x1d3   :  { %930 = vst [vmem:[#allocation5 + $0xa8] sm:$0xff] %v898_v32  ;;  %932 = vst [vmem:[#allocation5 + $0xb8] sm:$0xff] %v900_v33  ;;  %v905_v39 = vmax.f32 %v784_v34, 0.0  ;;  %v907_v40 = vmax.f32 %v873_v35, 0.0  ;;  %v786_v27 = vadd.f32 %v785_v36, %v1284_v47  ;;  %v875_v41 = vadd.f32 %v874_v37, %v1284_v47 }
 0x1d5   :  { %937 = vst [vmem:[#allocation5 + $0xe0] sm:$0xff] %v905_v39  ;;  %939 = vst [vmem:[#allocation5 + $0xf0] sm:$0xff] %v907_v40  ;;  %v906_v42 = vmax.f32 %v786_v27, 0.0  ;;  %v908_v44 = vmax.f32 %v875_v41, 0.0 }
 0x1d7   :  { %938 = vst [vmem:[#allocation5 + $0xe8] sm:$0xff] %v906_v42  ;;  %940 = vst [vmem:[#allocation5 + $0xf8] sm:$0xff] %v908_v44 }
 0x1d8   :  { %1029 = shalt.err (!%p1026_p9)
}
 0x1d9   :  { %952 = dma.vmem_to_hbm [thread:$0]  %s947_s29, 4096, %s1317_s5, [#allocation4], %s1043_s21, %s1043_s21, %s1044_s22  }
 0x1da   :  { %1040 = dma.done.wait [#allocation4], 4096  }
 0x1db   :  { %1041 = vsyncadd [#allocation4], 4294963200 }
 0x1dc   :  { %956 = vsyncpa [#allocation3], 1 }
 0x1dd   :  { %957 = vsyncpa [#allocation4], 1 }

</bundles_post_ra>
